<compile_context>
chip_gen: v7x
topology: tpu7x:2x2x1
jax: 0.10.0
libtpu: 0.0.40
codegen_flags: <defaults>
</compile_context>

<pallas_src>
import math
from functools import partial

import jax
import jax.numpy as jnp
from jax import lax
from jax.experimental import pallas as pl
from jax.experimental.pallas import tpu as pltpu


# --------------------------------------------------------------------------
# Fused kernel: one batch element per grid step
# --------------------------------------------------------------------------
def _fused_attention_kernel(x_ref, wqkv_ref, wproj_ref, bias_ref, o_ref,
                            qkv_ref, attn_ref, *, num_heads):
    """Refs (leading batch dim of x/o squeezed by the BlockSpec):

    x_ref     : (N, C)    activations (caller dtype, cast to bf16 here)
    wqkv_ref  : (C, 3C)   bf16, columns [q | k | v] head-major, scale in q
    wproj_ref : (C, C)    bf16, rows head-major (already transposed)
    bias_ref  : (1, C)    f32 projection bias
    o_ref     : (N, C)    output block (lane-dense store)
    qkv_ref   : (N, 3C)   f32 VMEM scratch
    attn_ref  : (N, C)    f32 VMEM scratch (per-head outputs, head-major cols)
    """
    c = x_ref.shape[-1]
    hd = c // num_heads

    xb = x_ref[...].astype(jnp.bfloat16)

    # qkv projection: one wide MXU matmul (full 3C output width), f32 acc.
    # Softmax scale is already folded into the q columns of wqkv.
    qkv_ref[...] = jnp.dot(xb, wqkv_ref[...],
                           preferred_element_type=jnp.float32)

    for h in range(num_heads):
        off = h * hd
        q = qkv_ref[:, off:off + hd].astype(jnp.bfloat16)            # (N, hd)
        k = qkv_ref[:, c + off:c + off + hd].astype(jnp.bfloat16)    # (N, hd)
        v = qkv_ref[:, 2 * c + off:2 * c + off + hd].astype(jnp.bfloat16)

        # q @ k^T without materialising a transpose (contract last dims).
        s = lax.dot_general(q, k, (((1,), (1,)), ((), ())),
                            preferred_element_type=jnp.float32)      # (N, N)
        m = s.max(axis=-1, keepdims=True)
        p = jnp.exp(s - m)                      # values in (0, 1] -> bf16-safe
        l = p.sum(axis=-1, keepdims=True)

        o_h = jnp.dot(p.astype(jnp.bfloat16), v,
                      preferred_element_type=jnp.float32)             # (N, hd)
        # Normalise after PV: N*hd multiplies instead of N^2; recip on the EUP.
        o_h = o_h * pl.reciprocal(l, approx=True)

        attn_ref[:, off:off + hd] = o_h        # head-major column write

    # Output projection: one wide MXU matmul + bias, single lane-dense store.
    out = jnp.dot(attn_ref[...].astype(jnp.bfloat16), wproj_ref[...],
                  preferred_element_type=jnp.float32) + bias_ref[...]
    o_ref[...] = out.astype(o_ref.dtype)


# --------------------------------------------------------------------------
# One-time parameter preparation (outside the hot path)
# --------------------------------------------------------------------------
def prepare_params(params, num_heads):
    """Reorganise PyTorch-layout weights once: transpose, fold the softmax
    scale into the q columns, cast to bf16 for the MXU."""
    w_qkv = jnp.asarray(params["w_qkv"], jnp.float32)    # (3C, C), torch (out,in)
    w_proj = jnp.asarray(params["w_proj"], jnp.float32)  # (C, C)
    b_proj = jnp.asarray(params["b_proj"], jnp.float32)  # (C,)

    three_c, c = w_qkv.shape
    assert three_c == 3 * c and c % num_heads == 0
    scale = (c // num_heads) ** (-0.5)

    wqkv_t = w_qkv.T                                     # (C, 3C), [q|k|v] head-major
    wqkv_t = wqkv_t.at[:, :c].multiply(scale)            # fold scale into q
    return {
        "wqkv": wqkv_t.astype(jnp.bfloat16),             # (C, 3C)
        "wproj": w_proj.T.astype(jnp.bfloat16),          # (C, C), head-major rows
        "bias": b_proj.reshape(1, c),                    # (1, C) f32
    }


# --------------------------------------------------------------------------
# Full module forward (mirrors dino.Attention.forward)
# --------------------------------------------------------------------------
def attention_forward(x, prepared, num_heads):
    B, N, C = x.shape
    wqkv, wproj, bias = prepared["wqkv"], prepared["wproj"], prepared["bias"]
    assert wqkv.shape == (C, 3 * C) and wproj.shape == (C, C)

    kernel = partial(_fused_attention_kernel, num_heads=num_heads)
    return pl.pallas_call(
        kernel,
        out_shape=jax.ShapeDtypeStruct((B, N, C), x.dtype),
        grid_spec=pltpu.PrefetchScalarGridSpec(
            num_scalar_prefetch=0,
            grid=(B,),
            in_specs=[
                # Per-batch activation tile; leading dim squeezed.
                pl.BlockSpec((None, N, C), lambda b: (b, 0, 0)),
                # Weights / bias: constant block index -> fetched once,
                # VMEM-resident for the whole grid.
                pl.BlockSpec((C, 3 * C), lambda b: (0, 0)),
                pl.BlockSpec((C, C), lambda b: (0, 0)),
                pl.BlockSpec((1, C), lambda b: (0, 0)),
            ],
            out_specs=pl.BlockSpec((None, N, C), lambda b: (b, 0, 0)),
            scratch_shapes=[
                pltpu.VMEM((N, 3 * C), jnp.float32),   # qkv scratch
                pltpu.VMEM((N, C), jnp.float32),       # per-head attn outputs
            ],
        ),
        compiler_params=pltpu.CompilerParams(
            # Batch axis shards across TensorCores (megacore / v7x dual-TC).
            dimension_semantics=("parallel",),
            # ~14 MiB working set at ViT-B shapes; raise past v5e's 16 MiB
            # scoped default, stay well under v7x's 64 MiB physical VMEM.
            vmem_limit_bytes=32 * 1024 * 1024),
    )(x, wqkv, wproj, bias)


# --------------------------------------------------------------------------
# Pure-JAX f32 reference for a sanity check
# --------------------------------------------------------------------------
def attention_reference(x, params, num_heads):
    B, N, C = x.shape
    hd = C // num_heads
    scale = hd ** (-0.5)
    qkv = x @ params["w_qkv"].T
    qkv = qkv.reshape(B, N, 3, num_heads, hd).transpose(2, 0, 3, 1, 4)
    q, k, v = qkv[0], qkv[1], qkv[2]
    s = jnp.einsum("bhqd,bhkd->bhqk", q, k) * scale
    p = jax.nn.softmax(s, axis=-1)
    o = jnp.einsum("bhqk,bhkd->bhqd", p, v)
    o = o.transpose(0, 2, 1, 3).reshape(B, N, C)
    return o @ params["w_proj"].T + params["b_proj"]


if __name__ == "__main__":
    # Small shapes consistent with the module: dim=C=32, num_heads=8 -> hd=4.
    B, N, C = 2, 8, 32
    num_heads = 8

    key = jax.random.PRNGKey(0)
    k_x, k_wqkv, k_wproj, k_bproj = jax.random.split(key, 4)

    x = jax.random.normal(k_x, (B, N, C), dtype=jnp.float32)

    # Deterministic synthetic parameters (PyTorch Linear stores W as (out, in)).
    bound = 1.0 / math.sqrt(C)
    params = {
        "w_qkv": jax.random.uniform(k_wqkv, (3 * C, C), jnp.float32,
                                    -bound, bound),
        "w_proj": jax.random.uniform(k_wproj, (C, C), jnp.float32,
                                     -bound, bound),
        "b_proj": jax.random.uniform(k_bproj, (C,), jnp.float32,
                                     -bound, bound),
    }

    prepared = prepare_params(params, num_heads)        # one-time weight prep
    fwd = jax.jit(partial(attention_forward, num_heads=num_heads))
    out = jax.block_until_ready(fwd(x, prepared))

    ref = attention_reference(x, params, num_heads)
    assert out.shape == (B, N, C)
    # Tolerance covers bf16 MXU operands (weights/activations/probabilities)
    # and the approximate EUP reciprocal vs. the pure-f32 reference.
    assert jnp.allclose(out, ref, atol=5e-2, rtol=5e-2), "mismatch vs reference"

    print("KERNEL_OK")
</pallas_src>

<mosaic_0001>
module attributes {stable_mosaic.version = 11 : i64} {
  func.func @_fused_attention_kernel(%arg0: i32, %arg1: memref<1x8x32xf32, #tpu.memory_space<vmem>>, %arg2: memref<32x96xbf16, #tpu.memory_space<vmem>>, %arg3: memref<32x32xbf16, #tpu.memory_space<vmem>>, %arg4: memref<1x32xf32, #tpu.memory_space<vmem>>, %arg5: memref<1x8x32xf32, #tpu.memory_space<vmem>>, %arg6: memref<8x96xf32, #tpu.memory_space<vmem>>, %arg7: memref<8x32xf32, #tpu.memory_space<vmem>>) attributes {dimension_semantics = [#tpu.dimension_semantics<parallel>], iteration_bounds = array<i64: 2>, scalar_prefetch = 0 : i64, scratch_operands = 2 : i64, tpu.core_type = #tpu.core_type<tc>, window_params = [{transform_indices = @transform_0, window_bounds = array<i64: 1, 8, 32>}, {pipeline_mode = #tpu.pipeline_mode<synchronous>, transform_indices = @transform_1, window_bounds = array<i64: 32, 96>}, {pipeline_mode = #tpu.pipeline_mode<synchronous>, transform_indices = @transform_2, window_bounds = array<i64: 32, 32>}, {pipeline_mode = #tpu.pipeline_mode<synchronous>, transform_indices = @transform_3, window_bounds = array<i64: 1, 32>}, {transform_indices = @transform_4, window_bounds = array<i64: 1, 8, 32>}]} {
    %c0 = arith.constant 0 : index
    %c0_0 = arith.constant 0 : index
    %c0_1 = arith.constant 0 : index
    %0 = vector.load %arg1[%c0, %c0_0, %c0_1] : memref<1x8x32xf32, #tpu.memory_space<vmem>>, vector<1x8x32xf32>
    %1 = vector.shape_cast %0 : vector<1x8x32xf32> to vector<8x32xf32>
    %2 = arith.truncf %1 : vector<8x32xf32> to vector<8x32xbf16>
    %c0_2 = arith.constant 0 : index
    %c0_3 = arith.constant 0 : index
    %3 = vector.load %arg2[%c0_2, %c0_3] : memref<32x96xbf16, #tpu.memory_space<vmem>>, vector<32x96xbf16>
    %cst = arith.constant dense<0.000000e+00> : vector<8x96xf32>
    %4 = tpu.matmul %2, %3, %cst {dimension_numbers = #tpu.dot_dimension_numbers<[1], [0], [0], [1], [0, 0, 1, 1], [], []>} : vector<8x32xbf16>, vector<32x96xbf16>, vector<8x96xf32> -> vector<8x96xf32>
    %c0_4 = arith.constant 0 : index
    %c0_5 = arith.constant 0 : index
    %5 = vector.load %arg6[%c0_4, %c0_5] : memref<8x96xf32, #tpu.memory_space<vmem>>, vector<8x96xf32>
    tpu.vector_store %arg6[%c0_4, %c0_5], %4 {strides = array<i32>} : memref<8x96xf32, #tpu.memory_space<vmem>>, vector<8x96xf32>,
    %c0_6 = arith.constant 0 : index
    %c0_7 = arith.constant 0 : index
    %6 = vector.load %arg6[%c0_6, %c0_7] : memref<8x96xf32, #tpu.memory_space<vmem>>, vector<8x4xf32>
    %7 = arith.truncf %6 : vector<8x4xf32> to vector<8x4xbf16>
    %c0_8 = arith.constant 0 : index
    %c32 = arith.constant 32 : index
    %8 = vector.load %arg6[%c0_8, %c32] : memref<8x96xf32, #tpu.memory_space<vmem>>, vector<8x4xf32>
    %9 = arith.truncf %8 : vector<8x4xf32> to vector<8x4xbf16>
    %c0_9 = arith.constant 0 : index
    %c64 = arith.constant 64 : index
    %10 = vector.load %arg6[%c0_9, %c64] : memref<8x96xf32, #tpu.memory_space<vmem>>, vector<8x4xf32>
    %11 = arith.truncf %10 : vector<8x4xf32> to vector<8x4xbf16>
    %cst_10 = arith.constant dense<0.000000e+00> : vector<8x8xf32>
    %12 = tpu.matmul %7, %9, %cst_10 {dimension_numbers = #tpu.dot_dimension_numbers<[1], [1], [0], [0], [0, 0, 1, 0], [], []>} : vector<8x4xbf16>, vector<8x4xbf16>, vector<8x8xf32> -> vector<8x8xf32>
    %cst_11 = arith.constant dense<0xFF800000> : vector<8xf32>
    %13 = vector.multi_reduction <maximumf>, %12, %cst_11 [1] : vector<8x8xf32> to vector<8xf32>
    %14 = vector.shape_cast %13 : vector<8xf32> to vector<8x1xf32>
    %15 = vector.broadcast %14 : vector<8x1xf32> to vector<8x8xf32>
    %16 = arith.subf %12, %15 : vector<8x8xf32>
    %17 = math.exp %16 : vector<8x8xf32>
    %cst_12 = arith.constant dense<0.000000e+00> : vector<8xf32>
    %18 = vector.multi_reduction <add>, %17, %cst_12 [1] : vector<8x8xf32> to vector<8xf32>
    %19 = vector.shape_cast %18 : vector<8xf32> to vector<8x1xf32>
    %20 = arith.truncf %17 : vector<8x8xf32> to vector<8x8xbf16>
    %cst_13 = arith.constant dense<0.000000e+00> : vector<8x4xf32>
    %21 = tpu.matmul %20, %11, %cst_13 {dimension_numbers = #tpu.dot_dimension_numbers<[1], [0], [0], [1], [0, 0, 1, 1], [], []>} : vector<8x8xbf16>, vector<8x4xbf16>, vector<8x4xf32> -> vector<8x4xf32>
    %22 = tpu.reciprocal %19 {approx = true} : vector<8x1xf32> -> vector<8x1xf32>
    %23 = vector.broadcast %22 : vector<8x1xf32> to vector<8x4xf32>
    %24 = arith.mulf %21, %23 : vector<8x4xf32>
    %c0_14 = arith.constant 0 : index
    %c0_15 = arith.constant 0 : index
    %25 = vector.load %arg7[%c0_14, %c0_15] : memref<8x32xf32, #tpu.memory_space<vmem>>, vector<8x4xf32>
    tpu.vector_store %arg7[%c0_14, %c0_15], %24 {strides = array<i32>} : memref<8x32xf32, #tpu.memory_space<vmem>>, vector<8x4xf32>,
    %c0_16 = arith.constant 0 : index
    %c4 = arith.constant 4 : index
    %26 = vector.load %arg6[%c0_16, %c4] : memref<8x96xf32, #tpu.memory_space<vmem>>, vector<8x4xf32>
    %27 = arith.truncf %26 : vector<8x4xf32> to vector<8x4xbf16>
    %c0_17 = arith.constant 0 : index
    %c36 = arith.constant 36 : index
    %28 = vector.load %arg6[%c0_17, %c36] : memref<8x96xf32, #tpu.memory_space<vmem>>, vector<8x4xf32>
    %29 = arith.truncf %28 : vector<8x4xf32> to vector<8x4xbf16>
    %c0_18 = arith.constant 0 : index
    %c68 = arith.constant 68 : index
    %30 = vector.load %arg6[%c0_18, %c68] : memref<8x96xf32, #tpu.memory_space<vmem>>, vector<8x4xf32>
    %31 = arith.truncf %30 : vector<8x4xf32> to vector<8x4xbf16>
    %cst_19 = arith.constant dense<0.000000e+00> : vector<8x8xf32>
    %32 = tpu.matmul %27, %29, %cst_19 {dimension_numbers = #tpu.dot_dimension_numbers<[1], [1], [0], [0], [0, 0, 1, 0], [], []>} : vector<8x4xbf16>, vector<8x4xbf16>, vector<8x8xf32> -> vector<8x8xf32>
    %cst_20 = arith.constant dense<0xFF800000> : vector<8xf32>
    %33 = vector.multi_reduction <maximumf>, %32, %cst_20 [1] : vector<8x8xf32> to vector<8xf32>
    %34 = vector.shape_cast %33 : vector<8xf32> to vector<8x1xf32>
    %35 = vector.broadcast %34 : vector<8x1xf32> to vector<8x8xf32>
    %36 = arith.subf %32, %35 : vector<8x8xf32>
    %37 = math.exp %36 : vector<8x8xf32>
    %cst_21 = arith.constant dense<0.000000e+00> : vector<8xf32>
    %38 = vector.multi_reduction <add>, %37, %cst_21 [1] : vector<8x8xf32> to vector<8xf32>
    %39 = vector.shape_cast %38 : vector<8xf32> to vector<8x1xf32>
    %40 = arith.truncf %37 : vector<8x8xf32> to vector<8x8xbf16>
    %cst_22 = arith.constant dense<0.000000e+00> : vector<8x4xf32>
    %41 = tpu.matmul %40, %31, %cst_22 {dimension_numbers = #tpu.dot_dimension_numbers<[1], [0], [0], [1], [0, 0, 1, 1], [], []>} : vector<8x8xbf16>, vector<8x4xbf16>, vector<8x4xf32> -> vector<8x4xf32>
    %42 = tpu.reciprocal %39 {approx = true} : vector<8x1xf32> -> vector<8x1xf32>
    %43 = vector.broadcast %42 : vector<8x1xf32> to vector<8x4xf32>
    %44 = arith.mulf %41, %43 : vector<8x4xf32>
    %c0_23 = arith.constant 0 : index
    %c4_24 = arith.constant 4 : index
    %45 = vector.load %arg7[%c0_23, %c4_24] : memref<8x32xf32, #tpu.memory_space<vmem>>, vector<8x4xf32>
    tpu.vector_store %arg7[%c0_23, %c4_24], %44 {strides = array<i32>} : memref<8x32xf32, #tpu.memory_space<vmem>>, vector<8x4xf32>,
    %c0_25 = arith.constant 0 : index
    %c8 = arith.constant 8 : index
    %46 = vector.load %arg6[%c0_25, %c8] : memref<8x96xf32, #tpu.memory_space<vmem>>, vector<8x4xf32>
    %47 = arith.truncf %46 : vector<8x4xf32> to vector<8x4xbf16>
    %c0_26 = arith.constant 0 : index
    %c40 = arith.constant 40 : index
    %48 = vector.load %arg6[%c0_26, %c40] : memref<8x96xf32, #tpu.memory_space<vmem>>, vector<8x4xf32>
    %49 = arith.truncf %48 : vector<8x4xf32> to vector<8x4xbf16>
    %c0_27 = arith.constant 0 : index
    %c72 = arith.constant 72 : index
    %50 = vector.load %arg6[%c0_27, %c72] : memref<8x96xf32, #tpu.memory_space<vmem>>, vector<8x4xf32>
    %51 = arith.truncf %50 : vector<8x4xf32> to vector<8x4xbf16>
    %cst_28 = arith.constant dense<0.000000e+00> : vector<8x8xf32>
    %52 = tpu.matmul %47, %49, %cst_28 {dimension_numbers = #tpu.dot_dimension_numbers<[1], [1], [0], [0], [0, 0, 1, 0], [], []>} : vector<8x4xbf16>, vector<8x4xbf16>, vector<8x8xf32> -> vector<8x8xf32>
    %cst_29 = arith.constant dense<0xFF800000> : vector<8xf32>
    %53 = vector.multi_reduction <maximumf>, %52, %cst_29 [1] : vector<8x8xf32> to vector<8xf32>
    %54 = vector.shape_cast %53 : vector<8xf32> to vector<8x1xf32>
    %55 = vector.broadcast %54 : vector<8x1xf32> to vector<8x8xf32>
    %56 = arith.subf %52, %55 : vector<8x8xf32>
    %57 = math.exp %56 : vector<8x8xf32>
    %cst_30 = arith.constant dense<0.000000e+00> : vector<8xf32>
    %58 = vector.multi_reduction <add>, %57, %cst_30 [1] : vector<8x8xf32> to vector<8xf32>
    %59 = vector.shape_cast %58 : vector<8xf32> to vector<8x1xf32>
    %60 = arith.truncf %57 : vector<8x8xf32> to vector<8x8xbf16>
    %cst_31 = arith.constant dense<0.000000e+00> : vector<8x4xf32>
    %61 = tpu.matmul %60, %51, %cst_31 {dimension_numbers = #tpu.dot_dimension_numbers<[1], [0], [0], [1], [0, 0, 1, 1], [], []>} : vector<8x8xbf16>, vector<8x4xbf16>, vector<8x4xf32> -> vector<8x4xf32>
    %62 = tpu.reciprocal %59 {approx = true} : vector<8x1xf32> -> vector<8x1xf32>
    %63 = vector.broadcast %62 : vector<8x1xf32> to vector<8x4xf32>
    %64 = arith.mulf %61, %63 : vector<8x4xf32>
    %c0_32 = arith.constant 0 : index
    %c8_33 = arith.constant 8 : index
    %65 = vector.load %arg7[%c0_32, %c8_33] : memref<8x32xf32, #tpu.memory_space<vmem>>, vector<8x4xf32>
    tpu.vector_store %arg7[%c0_32, %c8_33], %64 {strides = array<i32>} : memref<8x32xf32, #tpu.memory_space<vmem>>, vector<8x4xf32>,
    %c0_34 = arith.constant 0 : index
    %c12 = arith.constant 12 : index
    %66 = vector.load %arg6[%c0_34, %c12] : memref<8x96xf32, #tpu.memory_space<vmem>>, vector<8x4xf32>
    %67 = arith.truncf %66 : vector<8x4xf32> to vector<8x4xbf16>
    %c0_35 = arith.constant 0 : index
    %c44 = arith.constant 44 : index
    %68 = vector.load %arg6[%c0_35, %c44] : memref<8x96xf32, #tpu.memory_space<vmem>>, vector<8x4xf32>
    %69 = arith.truncf %68 : vector<8x4xf32> to vector<8x4xbf16>
    %c0_36 = arith.constant 0 : index
    %c76 = arith.constant 76 : index
    %70 = vector.load %arg6[%c0_36, %c76] : memref<8x96xf32, #tpu.memory_space<vmem>>, vector<8x4xf32>
    %71 = arith.truncf %70 : vector<8x4xf32> to vector<8x4xbf16>
    %cst_37 = arith.constant dense<0.000000e+00> : vector<8x8xf32>
    %72 = tpu.matmul %67, %69, %cst_37 {dimension_numbers = #tpu.dot_dimension_numbers<[1], [1], [0], [0], [0, 0, 1, 0], [], []>} : vector<8x4xbf16>, vector<8x4xbf16>, vector<8x8xf32> -> vector<8x8xf32>
    %cst_38 = arith.constant dense<0xFF800000> : vector<8xf32>
    %73 = vector.multi_reduction <maximumf>, %72, %cst_38 [1] : vector<8x8xf32> to vector<8xf32>
    %74 = vector.shape_cast %73 : vector<8xf32> to vector<8x1xf32>
    %75 = vector.broadcast %74 : vector<8x1xf32> to vector<8x8xf32>
    %76 = arith.subf %72, %75 : vector<8x8xf32>
    %77 = math.exp %76 : vector<8x8xf32>
    %cst_39 = arith.constant dense<0.000000e+00> : vector<8xf32>
    %78 = vector.multi_reduction <add>, %77, %cst_39 [1] : vector<8x8xf32> to vector<8xf32>
    %79 = vector.shape_cast %78 : vector<8xf32> to vector<8x1xf32>
    %80 = arith.truncf %77 : vector<8x8xf32> to vector<8x8xbf16>
    %cst_40 = arith.constant dense<0.000000e+00> : vector<8x4xf32>
    %81 = tpu.matmul %80, %71, %cst_40 {dimension_numbers = #tpu.dot_dimension_numbers<[1], [0], [0], [1], [0, 0, 1, 1], [], []>} : vector<8x8xbf16>, vector<8x4xbf16>, vector<8x4xf32> -> vector<8x4xf32>
    %82 = tpu.reciprocal %79 {approx = true} : vector<8x1xf32> -> vector<8x1xf32>
    %83 = vector.broadcast %82 : vector<8x1xf32> to vector<8x4xf32>
    %84 = arith.mulf %81, %83 : vector<8x4xf32>
    %c0_41 = arith.constant 0 : index
    %c12_42 = arith.constant 12 : index
    %85 = vector.load %arg7[%c0_41, %c12_42] : memref<8x32xf32, #tpu.memory_space<vmem>>, vector<8x4xf32>
    tpu.vector_store %arg7[%c0_41, %c12_42], %84 {strides = array<i32>} : memref<8x32xf32, #tpu.memory_space<vmem>>, vector<8x4xf32>,
    %c0_43 = arith.constant 0 : index
    %c16 = arith.constant 16 : index
    %86 = vector.load %arg6[%c0_43, %c16] : memref<8x96xf32, #tpu.memory_space<vmem>>, vector<8x4xf32>
    %87 = arith.truncf %86 : vector<8x4xf32> to vector<8x4xbf16>
    %c0_44 = arith.constant 0 : index
    %c48 = arith.constant 48 : index
    %88 = vector.load %arg6[%c0_44, %c48] : memref<8x96xf32, #tpu.memory_space<vmem>>, vector<8x4xf32>
    %89 = arith.truncf %88 : vector<8x4xf32> to vector<8x4xbf16>
    %c0_45 = arith.constant 0 : index
    %c80 = arith.constant 80 : index
    %90 = vector.load %arg6[%c0_45, %c80] : memref<8x96xf32, #tpu.memory_space<vmem>>, vector<8x4xf32>
    %91 = arith.truncf %90 : vector<8x4xf32> to vector<8x4xbf16>
    %cst_46 = arith.constant dense<0.000000e+00> : vector<8x8xf32>
    %92 = tpu.matmul %87, %89, %cst_46 {dimension_numbers = #tpu.dot_dimension_numbers<[1], [1], [0], [0], [0, 0, 1, 0], [], []>} : vector<8x4xbf16>, vector<8x4xbf16>, vector<8x8xf32> -> vector<8x8xf32>
    %cst_47 = arith.constant dense<0xFF800000> : vector<8xf32>
    %93 = vector.multi_reduction <maximumf>, %92, %cst_47 [1] : vector<8x8xf32> to vector<8xf32>
    %94 = vector.shape_cast %93 : vector<8xf32> to vector<8x1xf32>
    %95 = vector.broadcast %94 : vector<8x1xf32> to vector<8x8xf32>
    %96 = arith.subf %92, %95 : vector<8x8xf32>
    %97 = math.exp %96 : vector<8x8xf32>
    %cst_48 = arith.constant dense<0.000000e+00> : vector<8xf32>
    %98 = vector.multi_reduction <add>, %97, %cst_48 [1] : vector<8x8xf32> to vector<8xf32>
    %99 = vector.shape_cast %98 : vector<8xf32> to vector<8x1xf32>
    %100 = arith.truncf %97 : vector<8x8xf32> to vector<8x8xbf16>
    %cst_49 = arith.constant dense<0.000000e+00> : vector<8x4xf32>
    %101 = tpu.matmul %100, %91, %cst_49 {dimension_numbers = #tpu.dot_dimension_numbers<[1], [0], [0], [1], [0, 0, 1, 1], [], []>} : vector<8x8xbf16>, vector<8x4xbf16>, vector<8x4xf32> -> vector<8x4xf32>
    %102 = tpu.reciprocal %99 {approx = true} : vector<8x1xf32> -> vector<8x1xf32>
    %103 = vector.broadcast %102 : vector<8x1xf32> to vector<8x4xf32>
    %104 = arith.mulf %101, %103 : vector<8x4xf32>
    %c0_50 = arith.constant 0 : index
    %c16_51 = arith.constant 16 : index
    %105 = vector.load %arg7[%c0_50, %c16_51] : memref<8x32xf32, #tpu.memory_space<vmem>>, vector<8x4xf32>
    tpu.vector_store %arg7[%c0_50, %c16_51], %104 {strides = array<i32>} : memref<8x32xf32, #tpu.memory_space<vmem>>, vector<8x4xf32>,
    %c0_52 = arith.constant 0 : index
    %c20 = arith.constant 20 : index
    %106 = vector.load %arg6[%c0_52, %c20] : memref<8x96xf32, #tpu.memory_space<vmem>>, vector<8x4xf32>
    %107 = arith.truncf %106 : vector<8x4xf32> to vector<8x4xbf16>
    %c0_53 = arith.constant 0 : index
    %c52 = arith.constant 52 : index
    %108 = vector.load %arg6[%c0_53, %c52] : memref<8x96xf32, #tpu.memory_space<vmem>>, vector<8x4xf32>
    %109 = arith.truncf %108 : vector<8x4xf32> to vector<8x4xbf16>
    %c0_54 = arith.constant 0 : index
    %c84 = arith.constant 84 : index
    %110 = vector.load %arg6[%c0_54, %c84] : memref<8x96xf32, #tpu.memory_space<vmem>>, vector<8x4xf32>
    %111 = arith.truncf %110 : vector<8x4xf32> to vector<8x4xbf16>
    %cst_55 = arith.constant dense<0.000000e+00> : vector<8x8xf32>
    %112 = tpu.matmul %107, %109, %cst_55 {dimension_numbers = #tpu.dot_dimension_numbers<[1], [1], [0], [0], [0, 0, 1, 0], [], []>} : vector<8x4xbf16>, vector<8x4xbf16>, vector<8x8xf32> -> vector<8x8xf32>
    %cst_56 = arith.constant dense<0xFF800000> : vector<8xf32>
    %113 = vector.multi_reduction <maximumf>, %112, %cst_56 [1] : vector<8x8xf32> to vector<8xf32>
    %114 = vector.shape_cast %113 : vector<8xf32> to vector<8x1xf32>
    %115 = vector.broadcast %114 : vector<8x1xf32> to vector<8x8xf32>
    %116 = arith.subf %112, %115 : vector<8x8xf32>
    %117 = math.exp %116 : vector<8x8xf32>
    %cst_57 = arith.constant dense<0.000000e+00> : vector<8xf32>
    %118 = vector.multi_reduction <add>, %117, %cst_57 [1] : vector<8x8xf32> to vector<8xf32>
    %119 = vector.shape_cast %118 : vector<8xf32> to vector<8x1xf32>
    %120 = arith.truncf %117 : vector<8x8xf32> to vector<8x8xbf16>
    %cst_58 = arith.constant dense<0.000000e+00> : vector<8x4xf32>
    %121 = tpu.matmul %120, %111, %cst_58 {dimension_numbers = #tpu.dot_dimension_numbers<[1], [0], [0], [1], [0, 0, 1, 1], [], []>} : vector<8x8xbf16>, vector<8x4xbf16>, vector<8x4xf32> -> vector<8x4xf32>
    %122 = tpu.reciprocal %119 {approx = true} : vector<8x1xf32> -> vector<8x1xf32>
    %123 = vector.broadcast %122 : vector<8x1xf32> to vector<8x4xf32>
    %124 = arith.mulf %121, %123 : vector<8x4xf32>
    %c0_59 = arith.constant 0 : index
    %c20_60 = arith.constant 20 : index
    %125 = vector.load %arg7[%c0_59, %c20_60] : memref<8x32xf32, #tpu.memory_space<vmem>>, vector<8x4xf32>
    tpu.vector_store %arg7[%c0_59, %c20_60], %124 {strides = array<i32>} : memref<8x32xf32, #tpu.memory_space<vmem>>, vector<8x4xf32>,
    %c0_61 = arith.constant 0 : index
    %c24 = arith.constant 24 : index
    %126 = vector.load %arg6[%c0_61, %c24] : memref<8x96xf32, #tpu.memory_space<vmem>>, vector<8x4xf32>
    %127 = arith.truncf %126 : vector<8x4xf32> to vector<8x4xbf16>
    %c0_62 = arith.constant 0 : index
    %c56 = arith.constant 56 : index
    %128 = vector.load %arg6[%c0_62, %c56] : memref<8x96xf32, #tpu.memory_space<vmem>>, vector<8x4xf32>
    %129 = arith.truncf %128 : vector<8x4xf32> to vector<8x4xbf16>
    %c0_63 = arith.constant 0 : index
    %c88 = arith.constant 88 : index
    %130 = vector.load %arg6[%c0_63, %c88] : memref<8x96xf32, #tpu.memory_space<vmem>>, vector<8x4xf32>
    %131 = arith.truncf %130 : vector<8x4xf32> to vector<8x4xbf16>
    %cst_64 = arith.constant dense<0.000000e+00> : vector<8x8xf32>
    %132 = tpu.matmul %127, %129, %cst_64 {dimension_numbers = #tpu.dot_dimension_numbers<[1], [1], [0], [0], [0, 0, 1, 0], [], []>} : vector<8x4xbf16>, vector<8x4xbf16>, vector<8x8xf32> -> vector<8x8xf32>
    %cst_65 = arith.constant dense<0xFF800000> : vector<8xf32>
    %133 = vector.multi_reduction <maximumf>, %132, %cst_65 [1] : vector<8x8xf32> to vector<8xf32>
    %134 = vector.shape_cast %133 : vector<8xf32> to vector<8x1xf32>
    %135 = vector.broadcast %134 : vector<8x1xf32> to vector<8x8xf32>
    %136 = arith.subf %132, %135 : vector<8x8xf32>
    %137 = math.exp %136 : vector<8x8xf32>
    %cst_66 = arith.constant dense<0.000000e+00> : vector<8xf32>
    %138 = vector.multi_reduction <add>, %137, %cst_66 [1] : vector<8x8xf32> to vector<8xf32>
    %139 = vector.shape_cast %138 : vector<8xf32> to vector<8x1xf32>
    %140 = arith.truncf %137 : vector<8x8xf32> to vector<8x8xbf16>
    %cst_67 = arith.constant dense<0.000000e+00> : vector<8x4xf32>
    %141 = tpu.matmul %140, %131, %cst_67 {dimension_numbers = #tpu.dot_dimension_numbers<[1], [0], [0], [1], [0, 0, 1, 1], [], []>} : vector<8x8xbf16>, vector<8x4xbf16>, vector<8x4xf32> -> vector<8x4xf32>
    %142 = tpu.reciprocal %139 {approx = true} : vector<8x1xf32> -> vector<8x1xf32>
    %143 = vector.broadcast %142 : vector<8x1xf32> to vector<8x4xf32>
    %144 = arith.mulf %141, %143 : vector<8x4xf32>
    %c0_68 = arith.constant 0 : index
    %c24_69 = arith.constant 24 : index
    %145 = vector.load %arg7[%c0_68, %c24_69] : memref<8x32xf32, #tpu.memory_space<vmem>>, vector<8x4xf32>
    tpu.vector_store %arg7[%c0_68, %c24_69], %144 {strides = array<i32>} : memref<8x32xf32, #tpu.memory_space<vmem>>, vector<8x4xf32>,
    %c0_70 = arith.constant 0 : index
    %c28 = arith.constant 28 : index
    %146 = vector.load %arg6[%c0_70, %c28] : memref<8x96xf32, #tpu.memory_space<vmem>>, vector<8x4xf32>
    %147 = arith.truncf %146 : vector<8x4xf32> to vector<8x4xbf16>
    %c0_71 = arith.constant 0 : index
    %c60 = arith.constant 60 : index
    %148 = vector.load %arg6[%c0_71, %c60] : memref<8x96xf32, #tpu.memory_space<vmem>>, vector<8x4xf32>
    %149 = arith.truncf %148 : vector<8x4xf32> to vector<8x4xbf16>
    %c0_72 = arith.constant 0 : index
    %c92 = arith.constant 92 : index
    %150 = vector.load %arg6[%c0_72, %c92] : memref<8x96xf32, #tpu.memory_space<vmem>>, vector<8x4xf32>
    %151 = arith.truncf %150 : vector<8x4xf32> to vector<8x4xbf16>
    %cst_73 = arith.constant dense<0.000000e+00> : vector<8x8xf32>
    %152 = tpu.matmul %147, %149, %cst_73 {dimension_numbers = #tpu.dot_dimension_numbers<[1], [1], [0], [0], [0, 0, 1, 0], [], []>} : vector<8x4xbf16>, vector<8x4xbf16>, vector<8x8xf32> -> vector<8x8xf32>
    %cst_74 = arith.constant dense<0xFF800000> : vector<8xf32>
    %153 = vector.multi_reduction <maximumf>, %152, %cst_74 [1] : vector<8x8xf32> to vector<8xf32>
    %154 = vector.shape_cast %153 : vector<8xf32> to vector<8x1xf32>
    %155 = vector.broadcast %154 : vector<8x1xf32> to vector<8x8xf32>
    %156 = arith.subf %152, %155 : vector<8x8xf32>
    %157 = math.exp %156 : vector<8x8xf32>
    %cst_75 = arith.constant dense<0.000000e+00> : vector<8xf32>
    %158 = vector.multi_reduction <add>, %157, %cst_75 [1] : vector<8x8xf32> to vector<8xf32>
    %159 = vector.shape_cast %158 : vector<8xf32> to vector<8x1xf32>
    %160 = arith.truncf %157 : vector<8x8xf32> to vector<8x8xbf16>
    %cst_76 = arith.constant dense<0.000000e+00> : vector<8x4xf32>
    %161 = tpu.matmul %160, %151, %cst_76 {dimension_numbers = #tpu.dot_dimension_numbers<[1], [0], [0], [1], [0, 0, 1, 1], [], []>} : vector<8x8xbf16>, vector<8x4xbf16>, vector<8x4xf32> -> vector<8x4xf32>
    %162 = tpu.reciprocal %159 {approx = true} : vector<8x1xf32> -> vector<8x1xf32>
    %163 = vector.broadcast %162 : vector<8x1xf32> to vector<8x4xf32>
    %164 = arith.mulf %161, %163 : vector<8x4xf32>
    %c0_77 = arith.constant 0 : index
    %c28_78 = arith.constant 28 : index
    %165 = vector.load %arg7[%c0_77, %c28_78] : memref<8x32xf32, #tpu.memory_space<vmem>>, vector<8x4xf32>
    tpu.vector_store %arg7[%c0_77, %c28_78], %164 {strides = array<i32>} : memref<8x32xf32, #tpu.memory_space<vmem>>, vector<8x4xf32>,
    %c0_79 = arith.constant 0 : index
    %c0_80 = arith.constant 0 : index
    %166 = vector.load %arg7[%c0_79, %c0_80] : memref<8x32xf32, #tpu.memory_space<vmem>>, vector<8x32xf32>
    %167 = arith.truncf %166 : vector<8x32xf32> to vector<8x32xbf16>
    %c0_81 = arith.constant 0 : index
    %c0_82 = arith.constant 0 : index
    %168 = vector.load %arg3[%c0_81, %c0_82] : memref<32x32xbf16, #tpu.memory_space<vmem>>, vector<32x32xbf16>
    %cst_83 = arith.constant dense<0.000000e+00> : vector<8x32xf32>
    %169 = tpu.matmul %167, %168, %cst_83 {dimension_numbers = #tpu.dot_dimension_numbers<[1], [0], [0], [1], [0, 0, 1, 1], [], []>} : vector<8x32xbf16>, vector<32x32xbf16>, vector<8x32xf32> -> vector<8x32xf32>
    %c0_84 = arith.constant 0 : index
    %c0_85 = arith.constant 0 : index
    %170 = vector.load %arg4[%c0_84, %c0_85] : memref<1x32xf32, #tpu.memory_space<vmem>>, vector<1x32xf32>
    %171 = vector.broadcast %170 : vector<1x32xf32> to vector<8x32xf32>
    %172 = arith.addf %169, %171 : vector<8x32xf32>
    %c0_86 = arith.constant 0 : index
    %c0_87 = arith.constant 0 : index
    %c0_88 = arith.constant 0 : index
    %173 = vector.load %arg5[%c0_86, %c0_87, %c0_88] : memref<1x8x32xf32, #tpu.memory_space<vmem>>, vector<1x8x32xf32>
    %174 = vector.shape_cast %173 : vector<1x8x32xf32> to vector<8x32xf32>
    %175 = vector.shape_cast %172 : vector<8x32xf32> to vector<1x8x32xf32>
    tpu.vector_store %arg5[%c0_86, %c0_87, %c0_88], %175 {strides = array<i32>} : memref<1x8x32xf32, #tpu.memory_space<vmem>>, vector<1x8x32xf32>,
    return
  }
  func.func @transform_0(%arg0: i32) -> (i32, i32, i32) {
    %c0_i32 = arith.constant 0 : i32
    %c0_i32_0 = arith.constant 0 : i32
    %c0_i32_1 = arith.constant 0 : i32
    return %arg0, %c0_i32, %c0_i32_0 : i32, i32, i32
  }
  func.func @transform_1(%arg0: i32) -> (i32, i32) {
    %c0_i32 = arith.constant 0 : i32
    %c0_i32_0 = arith.constant 0 : i32
    %c0_i32_1 = arith.constant 0 : i32
    return %c0_i32, %c0_i32_0 : i32, i32
  }
  func.func @transform_2(%arg0: i32) -> (i32, i32) {
    %c0_i32 = arith.constant 0 : i32
    %c0_i32_0 = arith.constant 0 : i32
    %c0_i32_1 = arith.constant 0 : i32
    return %c0_i32, %c0_i32_0 : i32, i32
  }
  func.func @transform_3(%arg0: i32) -> (i32, i32) {
    %c0_i32 = arith.constant 0 : i32
    %c0_i32_0 = arith.constant 0 : i32
    %c0_i32_1 = arith.constant 0 : i32
    return %c0_i32, %c0_i32_0 : i32, i32
  }
  func.func @transform_4(%arg0: i32) -> (i32, i32, i32) {
    %c0_i32 = arith.constant 0 : i32
    %c0_i32_0 = arith.constant 0 : i32
    %c0_i32_1 = arith.constant 0 : i32
    return %arg0, %c0_i32, %c0_i32_0 : i32, i32, i32
  }
}

</mosaic_0001>

<bundles_post_ra>
// kernel: attention_forward.1
= control target key start
LH: loop header
LB: loop body
LE: loop exit
PB: predicated region body
PF: predicated region fallthrough
CT: control target
= control target key end

     0   :  { %9 = vsyncpa [#allocation5], 0  ;;  %s2377_s0 = inlined_call_operand.hbm [shape: f32[2,8,32], index: 0, kind: input, shape index: {}]   ;;  %s2378_s1 = inlined_call_operand.hbm [shape: bf16[32,96], index: 1, kind: input, shape index: {}]   ;;  %s2379_s2 = inlined_call_operand.hbm [shape: bf16[32,32], index: 2, kind: input, shape index: {}]   ;;  %s2380_s3 = inlined_call_operand.vmem [shape: f32[1,32], index: 3, kind: input, shape index: {}]   ;;  %s2381_s4 = inlined_call_operand.hbm [shape: f32[2,8,32], index: 4, kind: output, shape index: {}]  }
   0x1   :  { %11 = vsyncpa [#allocation5 + $0x1], 0 }
   0x2   :  { %12 = vsyncpa [#allocation8], 0 }
   0x3   :  { %13 = vsyncpa [#allocation6], 0 }
   0x4   :  { %15 = vsyncpa [#allocation6 + $0x1], 0  ;;  %s1974_s15 = smov 0   ;;  %s1976_s16 = smov 0  }
   0x5   :  { %s1978_s17 = smov 0   ;;  %s1980_s18 = smov 0  }
   0x6 LB: > { %s1995_s19 = sadd.s32 4294967295, %s1909_s18   ;;  %s1427_s20 = sadd.s32 4294967294, %s1909_s18   ;;  %s1909_s18 = sphi %s1980_s18, %s2401_s18   ;;  %s1905_s17 = sphi %s1978_s17, %s2400_s17   ;;  %s1901_s16 = sphi %s1976_s16, %s2399_s16   ;;  %s1897_s15 = sphi %s1974_s15, %s2398_s15  }
   0x7   : > { %p41_p0 = scmp.ne.s32.totalorder %s1901_s16, %s1897_s15  ;;  %p2382_p1 = scmp.eq.s32.totalorder %s1995_s19, 0 }
   0x8   : > { %p134_p3 = scmp.eq.s32.totalorder %s1427_s20, 1  ;;  %p1428_p5 = scmp.ge.s32.totalorder %s1909_s18, 1 }
   0x9   : > { %p2004_p4 = por %p2382_p1, %p41_p0  ;;  %p141_p7 = scmp.lt.s32.totalorder %s1909_s18, 3 }
   0xa   : > { %p2009_p6 = por %p134_p3, %p41_p0  ;;  %s1911_s24 = smov [#allocation7]  }
   0xb   : > { %s2385_s21 = scalar_select %p2004_p4, 1, 0 }
   0xc   : > { %s2386_s22 = scalar_select %p2009_p6, 1, 0 }
   0xd   : > { %p2014_p8 = pnand %p1428_p5, %p141_p7  ;;  %s153_s25 = sshll.u32 %s1911_s24, 4  ;;  %s2018_s25 = int_to_ptr.vmem [resolvable:$true] %s153_s25 }
   0xe   : > { %s1912_s27 = smov [#allocation9]   ;;  %s1753_s5 = scalar_lea.hbm %s2378_s1, 256 }
   0xf   : > { %p1628_p9 = pneg %p2014_p8  ;;  %s166_s28 = sshll.u32 %s1912_s27, 4  ;;  %s2029_s28 = int_to_ptr.vmem [resolvable:$true] %s166_s28 }
  0x10   : > { %p1754_p12 = scmp.ne.s32.totalorder %s2378_s1, %s1753_s5  ;;  %p1760_p5 = scmp.lt.u32.totalorder %s1753_s5, %s2378_s1 }
  0x11   : > { %p2025_p11 = pnand %p1628_p9, %p2382_p1 }
  0x13   : > { %p1755_p13 = pneg %p2025_p11 }
  0x15   : > { %p1756_p0 = pnand %p1755_p13, %p1754_p12 }
  0x17   : > { %p1757_p3 = pneg %p1756_p0 }
  0x19   : > { %p1762_p7 = pnand %p1760_p5, %p1757_p3 }
  0x1b   : > { %1765 = shalt.err (!%p1762_p7)
}
  0x1c   : > { %s1766_s10 = scalar_lea.vmem %s2018_s25, 256  ;;  %p1774_p2 = scmp.lt.s32.totalorder %s2018_s25, %s2018_s25 }
  0x1d   : > { %p1767_p9 = scmp.ne.s32.totalorder %s2018_s25, %s1766_s10  ;;  %p1775_p12 = scmp.lt.s32.totalorder %s1766_s10, %s1766_s10 }
  0x1f   : > { %p1769_p10 = pnand %p1767_p9, %p1755_p13  ;;  %p1776_p0 = por %p1775_p12, %p1774_p2 }
  0x21   : > { %p1770_p1 = pneg %p1769_p10 }
  0x23   : > { %p1777_p6 = pnand %p1776_p0, %p1770_p1 }
  0x25   : > { %1780 = shalt.err (!%p1777_p6)
}
  0x26   : > { %s1913_s11 = smov 64   ;;  %s1914_s12 = smov 4  }
  0x27   : > { %1631 = dma.hbm_to_vmem [thread:$0]  (!%p2025_p11), %s2378_s1, 256, %s2018_s25, [#allocation8], %s1913_s11, %s1913_s11, %s1914_s12  }
  0x28   : > { %s1781_s27 = scalar_lea.hbm %s2379_s2, 256 }
  0x29   : > { %p1782_p2 = scmp.ne.s32.totalorder %s2379_s2, %s1781_s27  ;;  %p1788_p10 = scmp.lt.u32.totalorder %s1781_s27, %s2379_s2 }
  0x2b   : > { %p1784_p1 = pnand %p1782_p2, %p1755_p13 }
  0x2d   : > { %p1785_p6 = pneg %p1784_p1 }
  0x2f   : > { %p1790_p3 = pnand %p1788_p10, %p1785_p6 }
  0x31   : > { %1793 = shalt.err (!%p1790_p3)
}
  0x32   : > { %s1794_s25 = scalar_lea.vmem %s2029_s28, 256  ;;  %p1802_p12 = scmp.lt.s32.totalorder %s2029_s28, %s2029_s28 }
  0x33   : > { %p1795_p5 = scmp.ne.s32.totalorder %s2029_s28, %s1794_s25  ;;  %p1803_p0 = scmp.lt.s32.totalorder %s1794_s25, %s1794_s25 }
  0x35   : > { %p1797_p7 = pnand %p1795_p5, %p1755_p13  ;;  %p1804_p2 = por %p1803_p0, %p1802_p12 }
  0x37   : > { %p1798_p9 = pneg %p1797_p7 }
  0x39   : > { %p1805_p1 = pnand %p1804_p2, %p1798_p9 }
  0x3b   : > { %1808 = shalt.err (!%p1805_p1)
}
  0x3c   : > { %1634 = dma.hbm_to_vmem [thread:$0]  (!%p2025_p11), %s2379_s2, 256, %s2029_s28, [#allocation8], %s1913_s11, %s1913_s11, %s1914_s12  }
  0x3d   : > { %s2084_s9 = sadd.s32 1, %s1909_s18   ;;  %s28_s26 = sadd.s32 1, %s1905_s17 }
  0x3e   : > { %s25_s10 = ssub.s32 %s1909_s18, %s2084_s9  ;;  %p35_p13 = scmp.ne.s32.totalorder %s1905_s17, %s1901_s16 }
  0x3f   : > { %p26_p6 = scmp.eq.s32.totalorder %s25_s10, 0  ;;  %p36_p10 = scmp.eq.s32.totalorder %s1909_s18, 0 }
  0x40   : > { %p2389_p3 = scmp.eq.s32.totalorder %s1995_s19, 1  ;;  %p1645_p7 = scmp.lt.s32.totalorder %s1909_s18, 2 }
  0x41   : > { %s2100_s14 = scalar_select %p26_p6, %s1905_s17, %s28_s26  }
  0x42   : > { %p2094_p5 = por %p2389_p3, %p35_p13  ;;  %p37_p9 = por %p36_p10, %p35_p13 }
  0x43   : > { %s183_s20 = sand.u32 1, %s1905_s17   ;;  %s1433_s28 = sshll.u32 %s1909_s18, 7 }
  0x44   : > { %s2390_s13 = scalar_select %p2094_p5, 1, 0 }
  0x45   : > { %s1432_s24 = sshll.u32 %s183_s20, 3  ;;  %s2107_s27 = scalar_lea.hbm %s2377_s0, %s1433_s28 }
  0x46   : > { %s187_s29 = scalar_lea.vmem [#allocation4], %s1432_s24  ;;  %p2111_p11 = pnand %p1645_p7, %p37_p9 }
  0x47   : > { %s194_s30 = sshll.u32 %s187_s29, 4  ;;  %s184_s6 = scalar_lea.sflag [#allocation5], %s183_s20  ;;  %s2109_s30 = int_to_ptr.vmem [resolvable:$true] %s194_s30 }
  0x48   : > { %s1809_s25 = scalar_lea.hbm %s2107_s27, 128  ;;  %p1811_p0 = pneg %p2111_p11 }
  0x49   : > { %p1810_p12 = scmp.ne.s32.totalorder %s2107_s27, %s1809_s25  ;;  %s1814_s26 = scalar_lea.hbm %s2377_s0, 256 }
  0x4a   : > { %p1815_p13 = scmp.lt.u32.totalorder %s2107_s27, %s2377_s0  ;;  %p1816_p6 = scmp.lt.u32.totalorder %s1814_s26, %s1809_s25 }
  0x4b   : > { %p1812_p2 = pnand %p1811_p0, %p1810_p12  ;;  %p1818_p3 = scmp.lt.u32.totalorder %s1809_s25, %s2107_s27 }
  0x4c   : > { %p1817_p10 = por %p1816_p6, %p1815_p13 }
  0x4d   : > { %p1813_p1 = pneg %p1812_p2 }
  0x4e   : > { %p1819_p7 = por %p1818_p3, %p1817_p10 }
  0x50   : > { %p1820_p9 = pnand %p1819_p7, %p1813_p1 }
  0x52   : > { %1823 = shalt.err (!%p1820_p9)
}
  0x53   : > { %s1824_s20 = scalar_lea.vmem %s2109_s30, 128  ;;  %s1915_s28 = smov [#allocation4]  }
  0x54   : > { %p1825_p12 = scmp.ne.s32.totalorder %s2109_s30, %s1824_s20  ;;  %s1829_s11 = sshll.u32 %s1915_s28, 4  ;;  %s1830_s11 = int_to_ptr.vmem [resolvable:$false] %s1829_s11 }
  0x55   : > { %s1831_s12 = scalar_lea.vmem %s1830_s11, 256  ;;  %p1832_p4 = scmp.lt.s32.totalorder %s2109_s30, %s1830_s11 }
  0x56   : > { %p1827_p2 = pnand %p1825_p12, %p1811_p0  ;;  %p1833_p13 = scmp.lt.s32.totalorder %s1831_s12, %s1824_s20 }
  0x58   : > { %p1828_p5 = pneg %p1827_p2  ;;  %p1834_p6 = por %p1833_p13, %p1832_p4 }
  0x5a   : > { %p1835_p10 = pnand %p1834_p6, %p1828_p5 }
  0x5c   : > { %1838 = shalt.err (!%p1835_p10)
}
  0x5d   : > { %1638 = dma.hbm_to_vmem [thread:$0]  (!%p2111_p11), %s2107_s27, 128, %s2109_s30, %s184_s6  }
  0x5e   : > { %203 = sbr.rel (%p2014_p8) target bundleno = 1484 (0x5cc), region = 36  ;;  %s2143_s29 = sand.u32 (!%p2014_p8), 1, %s1901_s16  }
  0x5f   : > { %s1435_s25 = sshll.u32 (!%p2014_p8), %s2143_s29, 3  ;;  %s206_s7 = scalar_lea.sflag (!%p2014_p8), [#allocation5], %s2143_s29 }
  0x60   : > { %s209_s8 = scalar_lea.vmem (!%p2014_p8), [#allocation4], %s1435_s25  ;;  %p2392_p4 = scmp.ne.s32.totalorder (!%p2014_p8), %s2385_s21, 0 }
  0x65   : > { %1884 = dma.done.wait (%p2392_p4), %s206_s7, 128  }
  0x66   : > { %1886 = vsyncadd (%p2392_p4), %s206_s7, 4294967168  ;;  %p2393_p5 = scmp.eq.s32.totalorder %s1995_s19, 0 }
  0x68   : > { %1888 = dma.done.wait (%p2393_p5), [#allocation8], 512   ;;  %p2394_p8 = pmov %p2393_p5 }
  0x69   : > { %v1916_v0 = vmov 0.0   ;;  %vm1917_vm0 = vmmov 0   ;;  %v1717_v1 = vld [vmem:[#allocation7] sm:$0xff]   ;;  %v1718_v2 = vld [vmem:[#allocation7 + $0x8] sm:$0xff]   ;;  %v243_v3 = vld [vmem:[%s209_s8] sm:$0xff]  ;;  %vm261_vm1 = vcmask 261120  }
  0x6a   : > { %1890 = vsyncadd (%p2394_p8), [#allocation8], 4294966784  ;;  %1504 = vmatprep.subr.bf16.mxu0 %v1916_v0  ;;  %1508 = vmatprep.mubr.msk.bf16.mxu0 %vm1917_vm0, %v1916_v0  ;;  %v244_v4 = vpack.c.bf16 %v243_v3, %v243_v3  ;;  %vm305_vm2 = vcmask 785408   ;;  %s1918_s21 = smov 124   ;;  %s1919_s23 = smov 96   ;;  %vm312_vm3 = vcmask 31744  }
  0x6b   : > { %1512 = vmatprep.subr.bf16.mxu1 %v1916_v0  ;;  %1514 = vmatprep.mubr.msk.bf16.mxu1 %vm1917_vm0, %v1916_v0  ;;  %s1920_s27 = smov 88   ;;  %s1921_s30 = smov 92   ;;  %vm375_vm4 = vcmask 1043456   ;;  %vm359_vm5 = vcmask 64512   ;;  %vm539_vm6 = vcmask 64544   ;;  %vm658_vm7 = vcmask 97344  }
  0x6c   : > { %1505 = vmatpush3.bf16.msra.mxu0 %v1717_v1  ;;  %s1922_s5 = smov 84   ;;  %s1923_s6 = smov 120   ;;  %vm777_vm8 = vcmask 130144   ;;  %vm896_vm9 = vcmask 162944   ;;  %vm1015_vm10 = vcmask 195744   ;;  %vm1134_vm11 = vcmask 228544  }
  0x6d   : > { %1506 = vmatprep.subr.bf16.mxu0 %v1916_v0  ;;  %s1924_s26 = smov 80   ;;  %s1925_s10 = smov 116   ;;  %vm1253_vm12 = vcmask 261344  }
  0x6e   : > { %s1926_s24 = smov 76   ;;  %s1927_s20 = smov 112  }
  0x6f   : > { %s1928_s28 = smov 72   ;;  %s1929_s11 = smov 108  }
  0x70   : > { %1507 = vmatpush3.bf16.msra.mxu0 %v1718_v2  ;;  %s1930_s12 = smov 68   ;;  %s1931_s7 = smov 104  }
  0x71   : > { %1518 = vmatprep.subr.bf16.mxu0 %v1916_v0  ;;  %s1932_s8 = smov 60   ;;  %p2395_p0 = scmp.ne.s32.totalorder %s2390_s13, 0 }
  0x73   : > { %1509 = vmatmul.mubr.msk.bf16.vlgmr.msra.gmra.mrb[0].mxu0 %vm261_vm1, %v244_v4 }
  0x74   : > { %1520 = vmatprep.mubr.msk.bf16.mxu0 %vm1917_vm0, %v1916_v0 }
 0x146   : > { %v299_v5 = vpop.f32.mrb[0].mxu0 }
 0x147   : > { %306 = vst.msk [vmem:[#allocation2] sm:$0xff] %vm305_vm2, %v299_v5  ;;  %v1510_v6 = vpop.f32.mrb[1].mxu0 }
 0x148   : > { %v302_v7 = vpop.f32.mrb[2].mxu0 }
 0x149   : > { %v1511_v8 = vpop.f32.mrb[3].mxu0 }
 0x14e   : > { %v422_v9 = vld [vmem:[#allocation2] sm:$0xff] }
 0x14f   : > { %v2168_v10 = vpack.c.bf16 %v422_v9, %v422_v9 }
 0x151   : > { %425 = vrot.lane.b32.xlu1 %v2168_v10, %s1918_s21  ;;  %310 = vrot.lane.b32.xlu0 %v2168_v10, %s1919_s23  ;;  %s1933_s21 = smov 100   ;;  %s1934_s23 = smov 64  }
 0x155   : > { %546 = vrot.lane.b32.xlu1 %v2168_v10, %s1920_s27  ;;  %427 = vrot.lane.b32.xlu0 %v2168_v10, %s1921_s30  ;;  %s1935_s27 = smov 56   ;;  %s1936_s30 = smov 52  }
 0x159   : > { %665 = vrot.lane.b32.xlu1 %v2168_v10, %s1922_s5  ;;  %544 = vrot.lane.b32.xlu0 %v2168_v10, %s1923_s6  ;;  %s1937_s5 = smov 48   ;;  %s1938_s6 = smov 44  }
 0x15d   : > { %784 = vrot.lane.b32.xlu1 %v2168_v10, %s1924_s26  ;;  %663 = vrot.lane.b32.xlu0 %v2168_v10, %s1925_s10  ;;  %s1939_s26 = smov 40   ;;  %s1940_s10 = smov 36  }
 0x161   : > { %903 = vrot.lane.b32.xlu1 %v2168_v10, %s1926_s24  ;;  %782 = vrot.lane.b32.xlu0 %v2168_v10, %s1927_s20  ;;  %s1941_s24 = smov 4   ;;  %s1942_s20 = smov 8  }
 0x165   : > { %1022 = vrot.lane.b32.xlu1 %v2168_v10, %s1928_s28  ;;  %901 = vrot.lane.b32.xlu0 %v2168_v10, %s1929_s11  ;;  %s1943_s28 = smov 12   ;;  %s1944_s11 = smov 16  }
 0x169   : > { %1141 = vrot.lane.b32.xlu1 %v2168_v10, %s1930_s12  ;;  %1020 = vrot.lane.b32.xlu0 %v2168_v10, %s1931_s7  ;;  %s1945_s12 = smov 20   ;;  %s1946_s7 = smov 24  }
 0x16d   : > { %485 = vrot.lane.b32.xlu1 %v2168_v10, %s1932_s8  ;;  %1139 = vrot.lane.b32.xlu0 %v2168_v10, %s1933_s21  ;;  %s1947_s8 = smov 28  }
 0x171   : > { %370 = vrot.lane.b32.xlu0 %v2168_v10, %s1934_s23 }
 0x1c3   : > { %v311_v11 = vpop.permute.xlu0 %310  ;;  %v426_v14 = vpop.permute.xlu1 %425 }
 0x1c4   : > { %v317_v12 = vsel %vm312_vm3, %v311_v11, 0 }
 0x1c5   : > { %1513 = vmatpush3.bf16.xpose.msra.mxu1 %v317_v12 }
 0x1c6   : > { %1524 = vmatprep.subr.bf16.mxu1 %v1916_v0 }
 0x1c7   : > { %v428_v13 = vpop.permute.xlu0 %427  ;;  %v547_v18 = vpop.permute.xlu1 %546 }
 0x1c8   : > { %v433_v16 = vsel %vm312_vm3, %v428_v13, 0  ;;  %v552_v20 = vsel %vm312_vm3, %v547_v18, 0 }
 0x1cb   : > { %v545_v15 = vpop.permute.xlu0 %544  ;;  %v666_v22 = vpop.permute.xlu1 %665 }
 0x1cc   : > { %1515 = vmatmul.mubr.msk.bf16.vlgmr.msra.gmra.mrb[0].mxu1 %vm312_vm3, %v2168_v10  ;;  %v671_v24 = vsel %vm312_vm3, %v666_v22, 0 }
 0x1cd   : > { %1525 = vmatpush3.bf16.xpose.msra.mxu1 %v433_v16  ;;  %1526 = vmatprep.mubr.msk.bf16.mxu1 %vm1917_vm0, %v1916_v0 }
 0x1ce   : > { %1536 = vmatprep.subr.bf16.mxu1 %v1916_v0 }
 0x1cf   : > { %v664_v17 = vpop.permute.xlu0 %663  ;;  %v785_v26 = vpop.permute.xlu1 %784 }
 0x1d0   : > { %v790_v28 = vsel %vm312_vm3, %v785_v26, 0 }
 0x1d3   : > { %v783_v19 = vpop.permute.xlu0 %782  ;;  %v904_v30 = vpop.permute.xlu1 %903 }
 0x1d4   : > { %1527 = vmatmul.mubr.msk.bf16.vlgmr.msra.gmra.mrb[4].mxu1 %vm312_vm3, %v426_v14  ;;  %v909_v31 = vsel %vm312_vm3, %v904_v30, 0 }
 0x1d5   : > { %1537 = vmatpush3.bf16.xpose.msra.mxu1 %v552_v20  ;;  %1538 = vmatprep.mubr.msk.bf16.mxu1 %vm1917_vm0, %v1916_v0 }
 0x1d6   : > { %1548 = vmatprep.subr.bf16.mxu1 %v1916_v0 }
 0x1d7   : > { %v902_v21 = vpop.permute.xlu0 %901  ;;  %v1023_v32 = vpop.permute.xlu1 %1022 }
 0x1d8   : > { %v1028_v33 = vsel %vm312_vm3, %v1023_v32, 0 }
 0x1db   : > { %v1021_v23 = vpop.permute.xlu0 %1020  ;;  %v1142_v34 = vpop.permute.xlu1 %1141 }
 0x1dc   : > { %1539 = vmatmul.mubr.msk.bf16.vlgmr.msra.gmra.mrb[8].mxu1 %vm312_vm3, %v545_v15  ;;  %v1147_v35 = vsel %vm312_vm3, %v1142_v34, 0 }
 0x1dd   : > { %1549 = vmatpush3.bf16.xpose.msra.mxu1 %v671_v24  ;;  %1550 = vmatprep.mubr.msk.bf16.mxu1 %vm1917_vm0, %v1916_v0 }
 0x1de   : > { %1560 = vmatprep.subr.bf16.mxu1 %v1916_v0 }
 0x1df   : > { %v1140_v25 = vpop.permute.xlu0 %1139  ;;  %v486_v14 = vpop.permute.xlu1 %485 }
 0x1e3   : > { %v371_v27 = vpop.permute.xlu0 %370 }
 0x1e4   : > { %v377_v29 = vsel %vm375_vm4, %v371_v27, 0  ;;  %1551 = vmatmul.mubr.msk.bf16.vlgmr.msra.gmra.mrb[12].mxu1 %vm312_vm3, %v664_v17 }
 0x1e5   : > { %1519 = vmatpush3.bf16.msra.mxu0 %v377_v29  ;;  %1561 = vmatpush3.bf16.xpose.msra.mxu1 %v790_v28 }
 0x1e6   : > { %1562 = vmatprep.mubr.msk.bf16.mxu1 %vm1917_vm0, %v1916_v0  ;;  %1572 = vmatprep.subr.bf16.mxu1 %v1916_v0 }
 0x1e7   : > { %1530 = vmatprep.subr.bf16.mxu0 %v1916_v0 }
 0x1ec   : > { %1563 = vmatmul.mubr.msk.bf16.vlgmr.msra.gmra.mrb[16].mxu1 %vm312_vm3, %v783_v19 }
 0x1ed   : > { %1573 = vmatpush3.bf16.xpose.msra.mxu1 %v909_v31  ;;  %1574 = vmatprep.mubr.msk.bf16.mxu1 %vm1917_vm0, %v1916_v0 }
 0x1ee   : > { %1584 = vmatprep.subr.bf16.mxu1 %v1916_v0 }
 0x1f4   : > { %1575 = vmatmul.mubr.msk.bf16.vlgmr.msra.gmra.mrb[20].mxu1 %vm312_vm3, %v902_v21 }
 0x1f5   : > { %1585 = vmatpush3.bf16.xpose.msra.mxu1 %v1028_v33  ;;  %1586 = vmatprep.mubr.msk.bf16.mxu1 %vm1917_vm0, %v1916_v0 }
 0x1f6   : > { %1596 = vmatprep.subr.bf16.mxu1 %v1916_v0 }
 0x1fc   : > { %1587 = vmatmul.mubr.msk.bf16.vlgmr.msra.gmra.mrb[24].mxu1 %vm312_vm3, %v1021_v23 }
 0x1fd   : > { %1597 = vmatpush3.bf16.xpose.msra.mxu1 %v1147_v35  ;;  %1598 = vmatprep.mubr.msk.bf16.mxu1 %vm1917_vm0, %v1916_v0 }
 0x1fe   : > { %1608 = vmatprep.subr.bf16.mxu1 %v1916_v0 }
 0x204   : > { %1599 = vmatmul.mubr.msk.bf16.vlgmr.msra.gmra.mrb[28].mxu1 %vm312_vm3, %v1140_v25 }
 0x205   : > { %1612 = vmatprep.mubr.msk.bf16.mxu1 %vm1917_vm0, %v1916_v0 }
 0x29f   : > { %v2230_v36 = vpop.f32.mrb[0].mxu1 }
 0x2a0   : > { %v1516_v37 = vpop.f32.mrb[1].mxu1  ;;  %v360_v38 = vsel %vm359_vm5, %v2230_v36, -inf }
 0x2a1   : > { %361 = vmax.xlane.f32.xlu1 %v360_v38  ;;  %v356_v39 = vpop.f32.mrb[2].mxu1 }
 0x2a2   : > { %v1517_v40 = vpop.f32.mrb[3].mxu1 }
 0x2a7   : > { %v469_v41 = vpop.f32.mrb[4].mxu1 }
 0x2a8   : > { %v1528_v42 = vpop.f32.mrb[5].mxu1  ;;  %v475_v43 = vsel %vm359_vm5, %v469_v41, -inf }
 0x2a9   : > { %476 = vmax.xlane.f32.xlu0 %v475_v43  ;;  %v472_v44 = vpop.f32.mrb[6].mxu1 }
 0x2aa   : > { %v1529_v45 = vpop.f32.mrb[7].mxu1 }
 0x2af   : > { %v2235_v46 = vpop.f32.mrb[8].mxu1 }
 0x2b0   : > { %v1540_v47 = vpop.f32.mrb[9].mxu1  ;;  %v594_v48 = vsel %vm359_vm5, %v2235_v46, -inf }
 0x2b1   : > { %595 = vmax.xlane.f32.xlu0 %v594_v48  ;;  %v591_v49 = vpop.f32.mrb[10].mxu1 }
 0x2b2   : > { %604 = vrot.lane.b32.xlu1 %v2168_v10, %s1935_s27  ;;  %v1541_v50 = vpop.f32.mrb[11].mxu1  ;;  %s1463_s27 = sshll.u32 %s1995_s19, 7  ;;  %s1325_s19 = scalar_lea.sflag [#allocation6], %s2143_s29 }
 0x2b7   : > { %v2240_v51 = vpop.f32.mrb[12].mxu1 }
 0x2b8   : > { %v1552_v52 = vpop.f32.mrb[13].mxu1  ;;  %v713_v4 = vsel %vm359_vm5, %v2240_v51, -inf }
 0x2b9   : > { %v710_v53 = vpop.f32.mrb[14].mxu1 }
 0x2ba   : > { %v1553_v54 = vpop.f32.mrb[15].mxu1 }
 0x2bf   : > { %v2242_v55 = vpop.f32.mrb[16].mxu1 }
 0x2c0   : > { %v1564_v56 = vpop.f32.mrb[17].mxu1  ;;  %v832_v8 = vsel %vm359_vm5, %v2242_v55, -inf }
 0x2c1   : > { %v829_v57 = vpop.f32.mrb[18].mxu1 }
 0x2c2   : > { %v1565_v58 = vpop.f32.mrb[19].mxu1 }
 0x2c7   : > { %723 = vrot.lane.b32.xlu0 %v2168_v10, %s1936_s30  ;;  %v2245_v59 = vpop.f32.mrb[20].mxu1  ;;  %s241_s30 = scalar_lea.vmem [#allocation10], %s1435_s25 }
 0x2c8   : > { %v1576_v60 = vpop.f32.mrb[21].mxu1  ;;  %v951_v13 = vsel %vm359_vm5, %v2245_v59, -inf }
 0x2c9   : > { %v948_v61 = vpop.f32.mrb[22].mxu1 }
 0x2ca   : > { %v1577_v62 = vpop.f32.mrb[23].mxu1 }
 0x2cf   : > { %v2247_v63 = vpop.f32.mrb[24].mxu1 }
 0x2d0   : > { %v1588_v1 = vpop.f32.mrb[25].mxu1  ;;  %v1070_v11 = vsel %vm359_vm5, %v2247_v63, -inf }
 0x2d1   : > { %v1067_v2 = vpop.f32.mrb[26].mxu1 }
 0x2d2   : > { %v1589_v3 = vpop.f32.mrb[27].mxu1 }
 0x2d6   : > { %714 = vmax.xlane.f32.xlu1 %v713_v4 }
 0x2d7   : > { %v2251_v5 = vpop.f32.mrb[28].mxu1 }
 0x2d8   : > { %v1600_v6 = vpop.f32.mrb[29].mxu1  ;;  %v1189_v12 = vsel %vm359_vm5, %v2251_v5, -inf }
 0x2d9   : > { %v1186_v7 = vpop.f32.mrb[30].mxu1 }
 0x2da   : > { %833 = vmax.xlane.f32.xlu1 %v832_v8  ;;  %v1601_v9 = vpop.f32.mrb[31].mxu1 }
 0x2de   : > { %1071 = vmax.xlane.f32.xlu1 %v1070_v11 }
 0x2e2   : > { %1190 = vmax.xlane.f32.xlu1 %v1189_v12 }
 0x2e6   : > { %952 = vmax.xlane.f32.xlu0 %v951_v13 }
 0x2f3   : > { %842 = vrot.lane.b32.xlu1 %v2168_v10, %s1937_s5  ;;  %s1338_s5 = sshll.u32 %s241_s30, 4  ;;  %s2334_s5 = int_to_ptr.vmem [resolvable:$true] %s1338_s5 }
 0x2f4   : > { %s1839_s25 = scalar_lea.vmem %s2334_s5, 128 }
 0x2f5   : > { %p1840_p11 = scmp.ne.s32.totalorder %s2334_s5, %s1839_s25 }
 0x2f7   : > { %p1841_p1 = pnand %p1840_p11, %p2395_p0 }
 0x2f9   : > { %p1842_p3 = pneg %p1841_p1 }
 0x2fc   : > { %961 = vrot.lane.b32.xlu0 %v2168_v10, %s1938_s6 }
 0x300   : > { %1080 = vrot.lane.b32.xlu0 %v2168_v10, %s1939_s26 }
 0x304   : > { %1199 = vrot.lane.b32.xlu0 %v2168_v10, %s1940_s10  ;;  %v491_v10 = vsel %vm375_vm4, %v486_v14, 0  ;;  %s2332_s10 = scalar_lea.hbm %s2381_s4, %s1463_s27 }
 0x32e   : > { %v362_v15 = vpop.xlane.xlu1 %361 }
 0x32f   : > { %v363_v16 = vsub.f32 %v2230_v36, %v362_v15 }
 0x331   : > { %v364_v17 = vmul.f32 1.442695, %v363_v16 }
 0x332   : > { %v605_v27 = vpop.permute.xlu1 %604 }
 0x333   : > { %1721 = vpow2.f32 %v364_v17  ;;  %v610_v30 = vsel %vm375_vm4, %v605_v27, 0 }
 0x336   : > { %v477_v18 = vpop.xlane.xlu0 %476 }
 0x337   : > { %v478_v19 = vsub.f32 %v469_v41, %v477_v18 }
 0x339   : > { %v479_v20 = vmul.f32 1.442695, %v478_v19 }
 0x33b   : > { %1723 = vpow2.f32 %v479_v20 }
 0x33d   : > { %v2266_v21 = vpop.eup %1721 }
 0x33e   : > { %v596_v22 = vpop.xlane.xlu0 %595  ;;  %v369_v23 = vpack.c.bf16 %v2266_v21, %v2266_v21 }
 0x33f   : > { %v597_v24 = vsub.f32 %v2235_v46, %v596_v22 }
 0x340   : > { %1521 = vmatmul.mubr.msk.bf16.vlgmr.msra.gmra.mrb[4].mxu0 %vm359_vm5, %v369_v23 }
 0x341   : > { %v598_v25 = vmul.f32 1.442695, %v597_v24  ;;  %1531 = vmatpush3.bf16.msra.mxu0 %v491_v10  ;;  %1532 = vmatprep.mubr.msk.bf16.mxu0 %vm1917_vm0, %v1916_v0 }
 0x342   : > { %1542 = vmatprep.subr.bf16.mxu0 %v1916_v0  ;;  %v724_v32 = vpop.permute.xlu0 %723 }
 0x343   : > { %1725 = vpow2.f32 %v598_v25  ;;  %v729_v35 = vsel %vm375_vm4, %v724_v32, 0 }
 0x345   : > { %v1724_v26 = vpop.eup %1723 }
 0x346   : > { %v481_v28 = vsel %vm359_vm5, %v1724_v26, 0.0  ;;  %v484_v29 = vpack.c.bf16 %v1724_v26, %v1724_v26 }
 0x347   : > { %482 = vadd.xlane.f32.xlu1 %v481_v28 }
 0x348   : > { %1533 = vmatmul.mubr.msk.bf16.vlgmr.msra.gmra.mrb[8].mxu0 %vm359_vm5, %v484_v29 }
 0x349   : > { %1543 = vmatpush3.bf16.msra.mxu0 %v610_v30  ;;  %1544 = vmatprep.mubr.msk.bf16.mxu0 %vm1917_vm0, %v1916_v0 }
 0x34a   : > { %1554 = vmatprep.subr.bf16.mxu0 %v1916_v0 }
 0x34d   : > { %v1726_v31 = vpop.eup %1725 }
 0x34e   : > { %v600_v33 = vsel %vm359_vm5, %v1726_v31, 0.0  ;;  %v603_v34 = vpack.c.bf16 %v1726_v31, %v1726_v31 }
 0x34f   : > { %601 = vadd.xlane.f32.xlu0 %v600_v33 }
 0x350   : > { %1545 = vmatmul.mubr.msk.bf16.vlgmr.msra.gmra.mrb[12].mxu0 %vm359_vm5, %v603_v34 }
 0x351   : > { %1555 = vmatpush3.bf16.msra.mxu0 %v729_v35  ;;  %1556 = vmatprep.mubr.msk.bf16.mxu0 %vm1917_vm0, %v1916_v0 }
 0x352   : > { %1566 = vmatprep.subr.bf16.mxu0 %v1916_v0 }
 0x363   : > { %v715_v36 = vpop.xlane.xlu1 %714 }
 0x364   : > { %v716_v37 = vsub.f32 %v2240_v51, %v715_v36 }
 0x366   : > { %v717_v38 = vmul.f32 1.442695, %v716_v37 }
 0x367   : > { %v834_v39 = vpop.xlane.xlu1 %833 }
 0x368   : > { %1727 = vpow2.f32 %v717_v38  ;;  %v835_v40 = vsub.f32 %v2242_v55, %v834_v39 }
 0x36a   : > { %v836_v41 = vmul.f32 1.442695, %v835_v40 }
 0x36b   : > { %v1072_v42 = vpop.xlane.xlu1 %1071 }
 0x36c   : > { %1729 = vpow2.f32 %v836_v41  ;;  %v1073_v43 = vsub.f32 %v2247_v63, %v1072_v42  ;;  %v366_v63 = vsel %vm359_vm5, %v2266_v21, 0.0 }
 0x36e   : > { %v1074_v44 = vmul.f32 1.442695, %v1073_v43 }
 0x36f   : > { %v1191_v45 = vpop.xlane.xlu1 %1190 }
 0x370   : > { %1731 = vpow2.f32 %v1074_v44  ;;  %v1192_v47 = vsub.f32 %v2251_v5, %v1191_v45 }
 0x372   : > { %v1728_v46 = vpop.eup %1727  ;;  %v1193_v55 = vmul.f32 1.442695, %v1192_v47 }
 0x373   : > { %v843_v48 = vpop.permute.xlu1 %842  ;;  %v953_v49 = vpop.xlane.xlu0 %952  ;;  %v719_v50 = vsel %vm359_vm5, %v1728_v46, 0.0  ;;  %v722_v51 = vpack.c.bf16 %v1728_v46, %v1728_v46 }
 0x374   : > { %v848_v52 = vsel %vm375_vm4, %v843_v48, 0  ;;  %v954_v53 = vsub.f32 %v2245_v59, %v953_v49  ;;  %720 = vadd.xlane.f32.xlu0 %v719_v50 }
 0x375   : > { %1557 = vmatmul.mubr.msk.bf16.vlgmr.msra.gmra.mrb[16].mxu0 %vm359_vm5, %v722_v51 }
 0x376   : > { %v1730_v54 = vpop.eup %1729  ;;  %v955_v56 = vmul.f32 1.442695, %v954_v53  ;;  %1567 = vmatpush3.bf16.msra.mxu0 %v848_v52  ;;  %1568 = vmatprep.mubr.msk.bf16.mxu0 %vm1917_vm0, %v1916_v0 }
 0x377   : > { %v838_v57 = vsel %vm359_vm5, %v1730_v54, 0.0  ;;  %1578 = vmatprep.subr.bf16.mxu0 %v1916_v0  ;;  %v962_v60 = vpop.permute.xlu0 %961  ;;  %v841_v61 = vpack.c.bf16 %v1730_v54, %v1730_v54 }
 0x378   : > { %1733 = vpow2.f32 %v955_v56  ;;  %839 = vadd.xlane.f32.xlu1 %v838_v57  ;;  %v967_v62 = vsel %vm375_vm4, %v962_v60, 0  ;;  %v1719_v56 = vld [vmem:[#allocation9] sm:$0xff]   ;;  %v1720_v60 = vld [vmem:[#allocation9 + $0x8] sm:$0xff]  }
 0x379   : > { %1735 = vpow2.f32 %v1193_v55  ;;  %1609 = vmatpush3.bf16.msra.mxu1 %v1719_v56 }
 0x37a   : > { %v1732_v58 = vpop.eup %1731  ;;  %1610 = vmatprep.subr.bf16.mxu1 %v1916_v0 }
 0x37b   : > { %v1076_v59 = vsel %vm359_vm5, %v1732_v58, 0.0  ;;  %v1081_v2 = vpop.permute.xlu0 %1080  ;;  %v1079_v9 = vpack.c.bf16 %v1732_v58, %v1732_v58 }
 0x37c   : > { %1077 = vadd.xlane.f32.xlu1 %v1076_v59  ;;  %v1086_v6 = vsel %vm375_vm4, %v1081_v2, 0 }
 0x37d   : > { %1569 = vmatmul.mubr.msk.bf16.vlgmr.msra.gmra.mrb[20].mxu0 %vm359_vm5, %v841_v61  ;;  %1611 = vmatpush3.bf16.msra.mxu1 %v1720_v60 }
 0x37e   : > { %1579 = vmatpush3.bf16.msra.mxu0 %v967_v62  ;;  %1580 = vmatprep.mubr.msk.bf16.mxu0 %vm1917_vm0, %v1916_v0 }
 0x37f   : > { %1590 = vmatprep.subr.bf16.mxu0 %v1916_v0  ;;  %v1200_v8 = vpop.permute.xlu0 %1199 }
 0x380   : > { %367 = vadd.xlane.f32.xlu1 %v366_v63  ;;  %v1205_v11 = vsel %vm375_vm4, %v1200_v8, 0 }
 0x382   : > { %v1734_v1 = vpop.eup %1733 }
 0x383   : > { %v957_v3 = vsel %vm359_vm5, %v1734_v1, 0.0  ;;  %v960_v4 = vpack.c.bf16 %v1734_v1, %v1734_v1  ;;  %v1736_v5 = vpop.eup %1735 }
 0x384   : > { %958 = vadd.xlane.f32.xlu0 %v957_v3  ;;  %v1195_v7 = vsel %vm359_vm5, %v1736_v5, 0.0  ;;  %v1198_v12 = vpack.c.bf16 %v1736_v5, %v1736_v5 }
 0x385   : > { %1581 = vmatmul.mubr.msk.bf16.vlgmr.msra.gmra.mrb[24].mxu0 %vm359_vm5, %v960_v4 }
 0x386   : > { %1591 = vmatpush3.bf16.msra.mxu0 %v1086_v6  ;;  %1592 = vmatprep.mubr.msk.bf16.mxu0 %vm1917_vm0, %v1916_v0 }
 0x387   : > { %1602 = vmatprep.subr.bf16.mxu0 %v1916_v0 }
 0x388   : > { %1196 = vadd.xlane.f32.xlu0 %v1195_v7 }
 0x38d   : > { %1593 = vmatmul.mubr.msk.bf16.vlgmr.msra.gmra.mrb[28].mxu0 %vm359_vm5, %v1079_v9 }
 0x38e   : > { %1603 = vmatpush3.bf16.msra.mxu0 %v1205_v11  ;;  %1604 = vmatprep.mubr.msk.bf16.mxu0 %vm1917_vm0, %v1916_v0 }
 0x395   : > { %1605 = vmatmul.mubr.msk.bf16.vlgmr.msra.gmra.mrb[32].mxu0 %vm359_vm5, %v1198_v12 }
 0x3d4   : > { %v483_v13 = vpop.xlane.xlu1 %482 }
 0x3dc   : > { %v602_v20 = vpop.xlane.xlu0 %601 }
 0x401   : > { %v721_v35 = vpop.xlane.xlu0 %720 }
 0x405   : > { %v840_v14 = vpop.xlane.xlu1 %839 }
 0x409   : > { %v1078_v15 = vpop.xlane.xlu1 %1077 }
 0x40d   : > { %v368_v16 = vpop.xlane.xlu1 %367 }
 0x40e   : > { %1737 = vrcp.f32 %v368_v16  ;;  %v1458_v16 = vld [vmem:[%s2380_s3] ss:$0 sm:$0xff] }
 0x40f   : > { %1739 = vrcp.f32 %v483_v13 }
 0x410   : > { %1741 = vrcp.f32 %v602_v20 }
 0x411   : > { %1743 = vrcp.f32 %v721_v35  ;;  %v959_v41 = vpop.xlane.xlu0 %958 }
 0x412   : > { %1745 = vrcp.f32 %v840_v14 }
 0x413   : > { %v413_v17 = vpop.f32.mrb[4].mxu0  ;;  %1747 = vrcp.f32 %v959_v41 }
 0x414   : > { %v1522_v18 = vpop.f32.mrb[5].mxu0  ;;  %1749 = vrcp.f32 %v1078_v15 }
 0x415   : > { %v416_v19 = vpop.f32.mrb[6].mxu0  ;;  %v1197_v54 = vpop.xlane.xlu0 %1196 }
 0x416   : > { %v1523_v21 = vpop.f32.mrb[7].mxu0  ;;  %1751 = vrcp.f32 %v1197_v54 }
 0x418   : > { %v1738_v22 = vpop.eup %1737 }
 0x419   : > { %v420_v23 = vmul.f32 %v1738_v22, %v413_v17  ;;  %v1740_v24 = vpop.eup %1739 }
 0x41a   : > { %v1742_v29 = vpop.eup %1741 }
 0x41b   : > { %421 = vst.msk [vmem:[#allocation3] sm:$0xff] %vm312_vm3, %v420_v23  ;;  %v527_v10 = vpop.f32.mrb[8].mxu0  ;;  %v1744_v36 = vpop.eup %1743 }
 0x41c   : > { %v534_v25 = vmul.f32 %v1740_v24, %v527_v10  ;;  %v1534_v26 = vpop.f32.mrb[9].mxu0  ;;  %v1746_v43 = vpop.eup %1745 }
 0x41d   : > { %v530_v27 = vpop.f32.mrb[10].mxu0  ;;  %v1748_v49 = vpop.eup %1747 }
 0x41e   : > { %536 = vrot.lane.b32.xlu0 %v534_v25, %s1941_s24  ;;  %v1535_v28 = vpop.f32.mrb[11].mxu0  ;;  %v1750_v57 = vpop.eup %1749  ;;  %s1948_s24 = smov [#allocation10]  }
 0x420   : > { %v1752_v1 = vpop.eup %1751 }
 0x423   : > { %v646_v30 = vpop.f32.mrb[12].mxu0 }
 0x424   : > { %v653_v31 = vmul.f32 %v1742_v29, %v646_v30  ;;  %v1546_v32 = vpop.f32.mrb[13].mxu0 }
 0x425   : > { %v649_v33 = vpop.f32.mrb[14].mxu0 }
 0x426   : > { %655 = vrot.lane.b32.xlu1 %v653_v31, %s1942_s20  ;;  %v1547_v34 = vpop.f32.mrb[15].mxu0  ;;  %s1843_s20 = sshll.u32 %s1948_s24, 4  ;;  %s1844_s20 = int_to_ptr.vmem [resolvable:$false] %s1843_s20 }
 0x427   : > { %p1846_p7 = scmp.lt.s32.totalorder %s2334_s5, %s1844_s20 }
 0x448   : > { %v765_v37 = vpop.f32.mrb[16].mxu0 }
 0x449   : > { %v772_v38 = vmul.f32 %v1744_v36, %v765_v37  ;;  %v1558_v39 = vpop.f32.mrb[17].mxu0 }
 0x44a   : > { %v768_v40 = vpop.f32.mrb[18].mxu0 }
 0x44b   : > { %774 = vrot.lane.b32.xlu1 %v772_v38, %s1943_s28  ;;  %v1559_v42 = vpop.f32.mrb[19].mxu0  ;;  %s1845_s28 = scalar_lea.vmem %s1844_s20, 256 }
 0x44c   : > { %p1847_p9 = scmp.lt.s32.totalorder %s1845_s28, %s1839_s25 }
 0x44e   : > { %p1848_p12 = por %p1847_p9, %p1846_p7 }
 0x450   : > { %v884_v44 = vpop.f32.mrb[20].mxu0  ;;  %p1849_p2 = pnand %p1848_p12, %p1842_p3 }
 0x451   : > { %v891_v45 = vmul.f32 %v1746_v43, %v884_v44  ;;  %v1570_v46 = vpop.f32.mrb[21].mxu0 }
 0x452   : > { %v887_v47 = vpop.f32.mrb[22].mxu0 }
 0x453   : > { %893 = vrot.lane.b32.xlu0 %v891_v45, %s1944_s11  ;;  %v1571_v48 = vpop.f32.mrb[23].mxu0 }
 0x458   : > { %v1003_v50 = vpop.f32.mrb[24].mxu0 }
 0x459   : > { %v1010_v51 = vmul.f32 %v1748_v49, %v1003_v50  ;;  %v1582_v52 = vpop.f32.mrb[25].mxu0 }
 0x45a   : > { %v1006_v53 = vpop.f32.mrb[26].mxu0 }
 0x45b   : > { %1012 = vrot.lane.b32.xlu1 %v1010_v51, %s1945_s12  ;;  %v1583_v55 = vpop.f32.mrb[27].mxu0 }
 0x460   : > { %v1122_v58 = vpop.f32.mrb[28].mxu0 }
 0x461   : > { %v1129_v59 = vmul.f32 %v1750_v57, %v1122_v58  ;;  %v1594_v61 = vpop.f32.mrb[29].mxu0 }
 0x462   : > { %v1125_v62 = vpop.f32.mrb[30].mxu0 }
 0x463   : > { %1131 = vrot.lane.b32.xlu0 %v1129_v59, %s1946_s7  ;;  %v1595_v63 = vpop.f32.mrb[31].mxu0 }
 0x468   : > { %v1241_v2 = vpop.f32.mrb[32].mxu0 }
 0x469   : > { %v1248_v3 = vmul.f32 %v1752_v1, %v1241_v2  ;;  %v1606_v4 = vpop.f32.mrb[33].mxu0 }
 0x46a   : > { %v1244_v5 = vpop.f32.mrb[34].mxu0 }
 0x46b   : > { %1250 = vrot.lane.b32.xlu1 %v1248_v3, %s1947_s8  ;;  %v1607_v6 = vpop.f32.mrb[35].mxu0 }
 0x490   : > { %v537_v7 = vpop.permute.xlu0 %536 }
 0x491   : > { %540 = vst.msk [vmem:[#allocation3] sm:$0xff] %vm539_vm6, %v537_v7 }
 0x498   : > { %v656_v8 = vpop.permute.xlu1 %655 }
 0x499   : > { %659 = vst.msk [vmem:[#allocation3] sm:$0xff] %vm658_vm7, %v656_v8 }
 0x4bd   : > { %v775_v0 = vpop.permute.xlu1 %774 }
 0x4be   : > { %778 = vst.msk [vmem:[#allocation3] sm:$0xff] %vm777_vm8, %v775_v0 }
 0x4c5   : > { %v894_v9 = vpop.permute.xlu0 %893 }
 0x4c6   : > { %897 = vst.msk [vmem:[#allocation3] sm:$0xff] %vm896_vm9, %v894_v9 }
 0x4cd   : > { %v1013_v11 = vpop.permute.xlu1 %1012 }
 0x4ce   : > { %1016 = vst.msk [vmem:[#allocation3] sm:$0xff] %vm1015_vm10, %v1013_v11 }
 0x4d5   : > { %v1132_v12 = vpop.permute.xlu0 %1131 }
 0x4d6   : > { %1135 = vst.msk [vmem:[#allocation3] sm:$0xff] %vm1134_vm11, %v1132_v12 }
 0x4dd   : > { %v1251_v13 = vpop.permute.xlu1 %1250 }
 0x4de   : > { %1254 = vst.msk [vmem:[#allocation3] sm:$0xff] %vm1253_vm12, %v1251_v13 }
 0x4e5   : > { %v1255_v14 = vld [vmem:[#allocation3] sm:$0xff] }
 0x4e6   : > { %v1256_v15 = vpack.c.bf16 %v1255_v14, %v1255_v14 }
 0x4e8   : > { %1613 = vmatmul.mubr.msk.bf16.vlgmr.msra.gmra.mrb[32].mxu1 %vm261_vm1, %v1256_v15 }
 0x5bb   : > { %v1317_v17 = vpop.f32.mrb[32].mxu1 }
 0x5bc   : > { %v1318_v18 = vadd.f32 %v1458_v16, %v1317_v17  ;;  %v1614_v19 = vpop.f32.mrb[33].mxu1 }
 0x5bd   : > { %v1320_v20 = vpop.f32.mrb[34].mxu1 }
 0x5be   : > { %v1615_v21 = vpop.f32.mrb[35].mxu1  ;;  %1323 = vst.msk [vmem:[%s241_s30] sm:$0xff] %vm261_vm1, %v1318_v18 }
 0x5bf   : > { %1852 = shalt.err (!%p1849_p2)
}
 0x5c0   : > { %s1853_s29 = scalar_lea.hbm %s2332_s10, 128  ;;  %s1857_s7 = scalar_lea.hbm %s2381_s4, 256 }
 0x5c1   : > { %p1854_p13 = scmp.ne.s32.totalorder %s2332_s10, %s1853_s29  ;;  %p1858_p4 = scmp.lt.u32.totalorder %s2332_s10, %s2381_s4 }
 0x5c2   : > { %p1859_p5 = scmp.lt.u32.totalorder %s1857_s7, %s1853_s29  ;;  %p1861_p11 = scmp.lt.u32.totalorder %s1853_s29, %s2332_s10 }
 0x5c3   : > { %p1855_p6 = pnand %p1854_p13, %p2395_p0 }
 0x5c4   : > { %p1860_p8 = por %p1859_p5, %p1858_p4 }
 0x5c5   : > { %p1856_p10 = pneg %p1855_p6 }
 0x5c6   : > { %p1862_p1 = por %p1861_p11, %p1860_p8 }
 0x5c8   : > { %p1863_p3 = pnand %p1862_p1, %p1856_p10 }
 0x5ca   : > { %1866 = shalt.err (!%p1863_p3)
}
 0x5cb   : > { %1626 = dma.vmem_to_hbm [thread:$0]  (%p2395_p0), %s2334_s5, 128, %s2332_s10, %s1325_s19  }
 0x5cc PF: > { %s1350_s23 = sand.u32 1, %s1897_s15   ;;  %p2396_p7 = scmp.ne.s32.totalorder %s2386_s22, 0 }
 0x5cd   : > { %p2397_p9 = scmp.ge.s32.totalorder %s1909_s18, 2  ;;  %s1351_s27 = scalar_lea.sflag [#allocation6], %s1350_s23 }
 0x5cf   : > { %p1640_p12 = pnand %p2397_p9, %p2396_p7 }
 0x5d1   : > { %1892 = dma.done.wait (!%p1640_p12), %s1351_s27, 128  }
 0x5d2   : > { %1894 = vsyncadd (!%p1640_p12), %s1351_s27, 4294967168  ;;  %p18_p2 = scmp.ge.s32.totalorder %s2084_s9, 4   ;;  %s2398_s15 = smov %s1901_s16 }
 0x5d3   : > { %s2399_s16 = smov %s1905_s17  ;;  %s2400_s17 = smov %s2100_s14 }
 0x5d4   : > { %s2401_s18 = smov %s2084_s9  ;;  %20 = sbr.rel (!%p18_p2) target bundleno = 6 (0x6), region = 89 }
 0x5db   :  { %1356 = vsyncpa [#allocation5], 1 }
 0x5dc   :  { %1358 = vsyncpa [#allocation5 + $0x1], 1 }
 0x5dd   :  { %1359 = vsyncpa [#allocation8], 1 }
 0x5de   :  { %1360 = vsyncpa [#allocation6], 1 }
 0x5df   :  { %1362 = vsyncpa [#allocation6 + $0x1], 1 }

</bundles_post_ra>
